<compile_context>
chip_gen: v5e
topology: v5e:2x2
jax: 0.10.0
libtpu: 0.0.40
codegen_flags: <defaults>
</compile_context>

<pallas_src>
import functools

import jax
import jax.numpy as jnp
from jax.experimental import pallas as pl
from jax.experimental.pallas import tpu as pltpu

SAMPLE_LEN = 1024
HIDDEN = 128
NUM_CLASSES = 4
LANE = 128          # class dim lane-padded to one full 128-lane vreg width
BATCH = 8
MAX_TM = 1024       # batch-tile cap (sweepable 512..2048; 1024 ~ roofline plateau)


def mlp_kernel(x_ref, w1_ref, b1_ref, w2_ref, b2_ref, o_ref):
    # f32 x tile -> bf16 on the VPU (filler that hides under the x DMA).
    x = x_ref[...].astype(jnp.bfloat16)
    # fc1 on the MXU, f32 accumulation.
    h = jnp.dot(x, w1_ref[...], preferred_element_type=jnp.float32)
    h = jnp.maximum(h + b1_ref[...], 0.0)             # bias + ReLU on the VPU
    # fc2: lane-padded (HIDDEN, 128) bf16 weight -> lane-dense output store.
    out = jnp.dot(h.astype(jnp.bfloat16), w2_ref[...],
                  preferred_element_type=jnp.float32)
    o_ref[...] = (out + b2_ref[...]).astype(o_ref.dtype)   # bf16 writeback


def _round_up(n, m):
    return ((n + m - 1) // m) * m


def _choose_tiling(B):
    """Batch tile + padded batch. Bounds zero-row padding to <8 rows and keeps
    >=2 grid steps once B is large enough to feed both v7x TensorCores."""
    n_steps = max(pl.cdiv(B, MAX_TM), 2 if B >= 1024 else 1)
    tm = max(8, _round_up(pl.cdiv(B, n_steps), 8))
    b_pad = _round_up(B, tm)
    return tm, b_pad


def prepare_params(w1, b1, w2, b2):
    """One-time parameter prep (hoisted out of the per-call path).

    w1: (SAMPLE_LEN, HIDDEN)   (PyTorch fc1.weight transposed)
    b1: (HIDDEN,)
    w2: (HIDDEN, num_classes)  (PyTorch fc2.weight transposed)
    b2: (num_classes,)
    """
    num_classes = w2.shape[1]
    w1_b = w1.astype(jnp.bfloat16)
    b1_r = b1.reshape(1, HIDDEN).astype(jnp.float32)
    w2_p = jnp.zeros((HIDDEN, LANE), jnp.bfloat16).at[:, :num_classes].set(
        w2.astype(jnp.bfloat16))
    b2_p = jnp.zeros((1, LANE), jnp.float32).at[:, :num_classes].set(
        b2.astype(jnp.float32))
    return (w1_b, b1_r, w2_p, b2_p), num_classes


@functools.partial(jax.jit, static_argnames=("num_classes",))
def simple_signal_net(x, params, *, num_classes):
    """Fused fc1 -> ReLU -> fc2.  x: (B, SAMPLE_LEN) f32 -> (B, num_classes) f32."""
    w1_b, b1_r, w2_p, b2_p = params
    B = x.shape[0]
    tm, b_pad = _choose_tiling(B)

    # x stays f32; pad only the final partial tile (<8 rows of waste).
    x_p = x if b_pad == B else jnp.pad(x, ((0, b_pad - B), (0, 0)))

    grid = (b_pad // tm,)
    flops = 2 * b_pad * (SAMPLE_LEN * HIDDEN + HIDDEN * LANE)
    bytes_accessed = (x_p.size * 4            # x read as f32
                      + w1_b.size * 2 + w2_p.size * 2
                      + b1_r.size * 4 + b2_p.size * 4
                      + b_pad * LANE * 2)     # bf16 output writeback

    out = pl.pallas_call(
        mlp_kernel,
        out_shape=jax.ShapeDtypeStruct((b_pad, LANE), jnp.bfloat16),
        grid=grid,
        in_specs=[
            pl.BlockSpec((tm, SAMPLE_LEN), lambda i: (i, 0)),      # x: tiled over batch
            pl.BlockSpec((SAMPLE_LEN, HIDDEN), lambda i: (0, 0)),  # w1: VMEM-resident
            pl.BlockSpec((1, HIDDEN), lambda i: (0, 0)),           # b1
            pl.BlockSpec((HIDDEN, LANE), lambda i: (0, 0)),        # w2: VMEM-resident
            pl.BlockSpec((1, LANE), lambda i: (0, 0)),             # b2
        ],
        out_specs=pl.BlockSpec((tm, LANE), lambda i: (i, 0)),
        compiler_params=pltpu.CompilerParams(
            dimension_semantics=("parallel",),   # batch axis shards across v7x TCs
            vmem_limit_bytes=32 * 1024 * 1024),  # sized against v7x 64 MiB VMEM
        cost_estimate=pl.CostEstimate(
            flops=flops, transcendentals=0, bytes_accessed=bytes_accessed),
    )(x_p, w1_b, b1_r, w2_p, b2_p)

    # Tiny fused slice + upcast back to f32 logits (matches the PyTorch interface).
    return out[:B, :num_classes].astype(jnp.float32)


def init_params(key, num_classes=NUM_CLASSES):
    """Deterministic init matching nn.Linear shapes (weights stored transposed)."""
    k1, k2, k3, k4 = jax.random.split(key, 4)
    lim1 = 1.0 / jnp.sqrt(SAMPLE_LEN)
    lim2 = 1.0 / jnp.sqrt(HIDDEN)
    w1 = jax.random.uniform(k1, (SAMPLE_LEN, HIDDEN), jnp.float32, -lim1, lim1)
    b1 = jax.random.uniform(k2, (HIDDEN,), jnp.float32, -lim1, lim1)
    w2 = jax.random.uniform(k3, (HIDDEN, num_classes), jnp.float32, -lim2, lim2)
    b2 = jax.random.uniform(k4, (num_classes,), jnp.float32, -lim2, lim2)
    return w1, b1, w2, b2


def reference(x, w1, b1, w2, b2):
    """Pure-JAX reference with the same bf16 rounding as the kernel."""
    # TODO(synk): bf16 weights/activations deviate slightly (~1e-3) from the
    # pure-f32 PyTorch module; the reference bakes in the identical rounding.
    xb = x.astype(jnp.bfloat16).astype(jnp.float32)
    w1b = w1.astype(jnp.bfloat16).astype(jnp.float32)
    w2b = w2.astype(jnp.bfloat16).astype(jnp.float32)
    h = jnp.maximum(xb @ w1b + b1.reshape(1, -1), 0.0)
    hb = h.astype(jnp.bfloat16).astype(jnp.float32)
    out = hb @ w2b + b2.reshape(1, -1)
    return out.astype(jnp.bfloat16).astype(jnp.float32)


if __name__ == "__main__":
    key = jax.random.PRNGKey(0)
    kx, kp = jax.random.split(key)
    x = jax.random.normal(kx, (BATCH, SAMPLE_LEN), jnp.float32)
    w1, b1, w2, b2 = init_params(kp)

    params, num_classes = prepare_params(w1, b1, w2, b2)   # one-time prep
    out = simple_signal_net(x, params, num_classes=num_classes)
    out = jax.block_until_ready(out)

    ref = reference(x, w1, b1, w2, b2)
    assert out.shape == (BATCH, NUM_CLASSES)
    assert out.dtype == jnp.float32
    assert jnp.allclose(out, ref, atol=2e-2, rtol=2e-2), \
        float(jnp.max(jnp.abs(out - ref)))
    print("KERNEL_OK")
</pallas_src>

<mosaic_0001>
module attributes {stable_mosaic.version = 11 : i64} {
  func.func @mlp_kernel(%arg0: i32, %arg1: memref<8x1024xf32, #tpu.memory_space<vmem>>, %arg2: memref<1024x128xbf16, #tpu.memory_space<vmem>>, %arg3: memref<1x128xf32, #tpu.memory_space<vmem>>, %arg4: memref<128x128xbf16, #tpu.memory_space<vmem>>, %arg5: memref<1x128xf32, #tpu.memory_space<vmem>>, %arg6: memref<8x128xbf16, #tpu.memory_space<vmem>>) attributes {dimension_semantics = [#tpu.dimension_semantics<parallel>], iteration_bounds = array<i64: 1>, scalar_prefetch = 0 : i64, scratch_operands = 0 : i64, tpu.core_type = #tpu.core_type<tc>, window_params = [{transform_indices = @transform_0, window_bounds = array<i64: 8, 1024>}, {pipeline_mode = #tpu.pipeline_mode<synchronous>, transform_indices = @transform_1, window_bounds = array<i64: 1024, 128>}, {pipeline_mode = #tpu.pipeline_mode<synchronous>, transform_indices = @transform_2, window_bounds = array<i64: 1, 128>}, {pipeline_mode = #tpu.pipeline_mode<synchronous>, transform_indices = @transform_3, window_bounds = array<i64: 128, 128>}, {pipeline_mode = #tpu.pipeline_mode<synchronous>, transform_indices = @transform_4, window_bounds = array<i64: 1, 128>}, {transform_indices = @transform_5, window_bounds = array<i64: 8, 128>}]} {
    %c0 = arith.constant 0 : index
    %c0_0 = arith.constant 0 : index
    %0 = vector.load %arg1[%c0, %c0_0] : memref<8x1024xf32, #tpu.memory_space<vmem>>, vector<8x1024xf32>
    %1 = arith.truncf %0 : vector<8x1024xf32> to vector<8x1024xbf16>
    %c0_1 = arith.constant 0 : index
    %c0_2 = arith.constant 0 : index
    %2 = vector.load %arg2[%c0_1, %c0_2] : memref<1024x128xbf16, #tpu.memory_space<vmem>>, vector<1024x128xbf16>
    %cst = arith.constant dense<0.000000e+00> : vector<8x128xf32>
    %3 = tpu.matmul %1, %2, %cst {dimension_numbers = #tpu.dot_dimension_numbers<[1], [0], [0], [1], [0, 0, 1, 1], [], []>} : vector<8x1024xbf16>, vector<1024x128xbf16>, vector<8x128xf32> -> vector<8x128xf32>
    %c0_3 = arith.constant 0 : index
    %c0_4 = arith.constant 0 : index
    %4 = vector.load %arg3[%c0_3, %c0_4] : memref<1x128xf32, #tpu.memory_space<vmem>>, vector<1x128xf32>
    %5 = vector.broadcast %4 : vector<1x128xf32> to vector<8x128xf32>
    %6 = arith.addf %3, %5 : vector<8x128xf32>
    %cst_5 = arith.constant 0.000000e+00 : f32
    %7 = vector.broadcast %cst_5 : f32 to vector<8x128xf32>
    %8 = arith.maximumf %6, %7 : vector<8x128xf32>
    %9 = arith.truncf %8 : vector<8x128xf32> to vector<8x128xbf16>
    %c0_6 = arith.constant 0 : index
    %c0_7 = arith.constant 0 : index
    %10 = vector.load %arg4[%c0_6, %c0_7] : memref<128x128xbf16, #tpu.memory_space<vmem>>, vector<128x128xbf16>
    %cst_8 = arith.constant dense<0.000000e+00> : vector<8x128xf32>
    %11 = tpu.matmul %9, %10, %cst_8 {dimension_numbers = #tpu.dot_dimension_numbers<[1], [0], [0], [1], [0, 0, 1, 1], [], []>} : vector<8x128xbf16>, vector<128x128xbf16>, vector<8x128xf32> -> vector<8x128xf32>
    %c0_9 = arith.constant 0 : index
    %c0_10 = arith.constant 0 : index
    %12 = vector.load %arg5[%c0_9, %c0_10] : memref<1x128xf32, #tpu.memory_space<vmem>>, vector<1x128xf32>
    %13 = vector.broadcast %12 : vector<1x128xf32> to vector<8x128xf32>
    %14 = arith.addf %11, %13 : vector<8x128xf32>
    %15 = arith.truncf %14 : vector<8x128xf32> to vector<8x128xbf16>
    %c0_11 = arith.constant 0 : index
    %c0_12 = arith.constant 0 : index
    %16 = vector.load %arg6[%c0_11, %c0_12] : memref<8x128xbf16, #tpu.memory_space<vmem>>, vector<8x128xbf16>
    tpu.vector_store %arg6[%c0_11, %c0_12], %15 {strides = array<i32>} : memref<8x128xbf16, #tpu.memory_space<vmem>>, vector<8x128xbf16>,
    return
  }
  func.func @transform_0(%arg0: i32) -> (i32, i32) {
    %c0_i32 = arith.constant 0 : i32
    %c0_i32_0 = arith.constant 0 : i32
    return %arg0, %c0_i32 : i32, i32
  }
  func.func @transform_1(%arg0: i32) -> (i32, i32) {
    %c0_i32 = arith.constant 0 : i32
    %c0_i32_0 = arith.constant 0 : i32
    %c0_i32_1 = arith.constant 0 : i32
    return %c0_i32, %c0_i32_0 : i32, i32
  }
  func.func @transform_2(%arg0: i32) -> (i32, i32) {
    %c0_i32 = arith.constant 0 : i32
    %c0_i32_0 = arith.constant 0 : i32
    %c0_i32_1 = arith.constant 0 : i32
    return %c0_i32, %c0_i32_0 : i32, i32
  }
  func.func @transform_3(%arg0: i32) -> (i32, i32) {
    %c0_i32 = arith.constant 0 : i32
    %c0_i32_0 = arith.constant 0 : i32
    %c0_i32_1 = arith.constant 0 : i32
    return %c0_i32, %c0_i32_0 : i32, i32
  }
  func.func @transform_4(%arg0: i32) -> (i32, i32) {
    %c0_i32 = arith.constant 0 : i32
    %c0_i32_0 = arith.constant 0 : i32
    %c0_i32_1 = arith.constant 0 : i32
    return %c0_i32, %c0_i32_0 : i32, i32
  }
  func.func @transform_5(%arg0: i32) -> (i32, i32) {
    %c0_i32 = arith.constant 0 : i32
    %c0_i32_0 = arith.constant 0 : i32
    return %arg0, %c0_i32 : i32, i32
  }
}

</mosaic_0001>

<bundles_post_ra>
// kernel: simple_signal_net.1
= control target key start
LH: loop header
LB: loop body
LE: loop exit
PB: predicated region body
PF: predicated region fallthrough
CT: control target
= control target key end

     0   :  { %10 = vsyncpa [#allocation3], 0  ;;  %s1288_s0 = inlined_call_operand.hbm [shape: f32[8,1024], index: 0, kind: input, shape index: {}]   ;;  %s1289_s1 = inlined_call_operand.hbm [shape: bf16[1024,128], index: 1, kind: input, shape index: {}]   ;;  %s1290_s2 = inlined_call_operand.vmem [shape: f32[1,128], index: 2, kind: input, shape index: {}]   ;;  %s1291_s3 = inlined_call_operand.hbm [shape: bf16[128,128], index: 3, kind: input, shape index: {}]   ;;  %s1292_s4 = inlined_call_operand.vmem [shape: f32[1,128], index: 4, kind: input, shape index: {}]   ;;  %s1293_s5 = inlined_call_operand.vmem [shape: bf16[8,128], index: 5, kind: output, shape index: {}]  }
   0x1   :  { %11 = vsyncpa [#allocation5], 0  ;;  %s27_s20 = sshll.u32 %s1289_s1, 4  ;;  %s1235_s21 = smov [#allocation4]   ;;  %s28_s20 = int_to_ptr.hbm [resolvable:$true] %s27_s20 }
   0x2   :  { %s29_s22 = sshll.u32 %s1235_s21, 4  ;;  %s17_s25 = sshll.u32 %s1288_s0, 4  ;;  %s30_s22 = int_to_ptr.vmem [resolvable:$true] %s29_s22  ;;  %s18_s25 = int_to_ptr.hbm [resolvable:$true] %s17_s25 }
   0x3   :  { %s1236_s26 = smov 64   ;;  %s1237_s27 = smov 4  }
   0x4   :  { %35 = dma.hbm_to_vmem [thread:$0]  %s28_s20, 8192, %s30_s22, [#allocation5], %s1236_s26, %s1236_s26, %s1237_s27  }
   0x5   :  { %s1238_s28 = smov [#allocation2]   ;;  %s42_s7 = sshll.u32 %s1291_s3, 4  ;;  %s43_s7 = int_to_ptr.hbm [resolvable:$true] %s42_s7 }
   0x6   :  { %s19_s29 = sshll.u32 %s1238_s28, 4  ;;  %s1239_s1 = smov [#allocation6]   ;;  %s20_s29 = int_to_ptr.vmem [resolvable:$true] %s19_s29 }
   0x7   :  { %22 = dma.hbm_to_vmem [thread:$0]  %s18_s25, 1024, %s20_s29, [#allocation3]  }
   0x8   :  { %s44_s8 = sshll.u32 %s1239_s1, 4  ;;  %s45_s8 = int_to_ptr.vmem [resolvable:$true] %s44_s8 }
   0x9   :  { %50 = dma.hbm_to_vmem [thread:$0]  %s43_s7, 1024, %s45_s8, [#allocation5], %s1236_s26, %s1236_s26, %s1237_s27  }
   0xa   :  { %1231 = dma.done.wait [#allocation3], 1024  }
   0xb   :  { %1232 = vsyncadd [#allocation3], 4294966272 }
   0xc   :  { %1233 = dma.done.wait [#allocation5], 9216  }
   0xd   :  { %1234 = vsyncadd [#allocation5], 4294958080  ;;  %v1087_v0 = vld [vmem:[#allocation4 + $0x38] sm:$0xff]  ;;  %v1086_v4 = vld [vmem:[#allocation4 + $0x30] sm:$0xff] }
   0xe   :  { %v1095_v1 = vld [vmem:[#allocation4 + $0x78] sm:$0xff]  ;;  %597 = vmatpush.bf16.msra.mxu0 %v1087_v0  ;;  %v1094_v5 = vld [vmem:[#allocation4 + $0x70] sm:$0xff]  ;;  %v1085_v8 = vld [vmem:[#allocation4 + $0x28] sm:$0xff] }
   0xf   :  { %v1103_v2 = vld [vmem:[#allocation4 + $0xb8] sm:$0xff]  ;;  %610 = vmatpush.bf16.msra.mxu1 %v1095_v1  ;;  %v1102_v6 = vld [vmem:[#allocation4 + $0xb0] sm:$0xff]  ;;  %v1093_v9 = vld [vmem:[#allocation4 + $0x68] sm:$0xff] }
  0x10   :  { %v1111_v3 = vld [vmem:[#allocation4 + $0xf8] sm:$0xff]  ;;  %623 = vmatpush.bf16.msra.mxu2 %v1103_v2  ;;  %v1110_v7 = vld [vmem:[#allocation4 + $0xf0] sm:$0xff]  ;;  %v1101_v10 = vld [vmem:[#allocation4 + $0xa8] sm:$0xff] }
  0x11   :  { %636 = vmatpush.bf16.msra.mxu3 %v1111_v3  ;;  %v1109_v11 = vld [vmem:[#allocation4 + $0xe8] sm:$0xff]  ;;  %v1084_v12 = vld [vmem:[#allocation4 + $0x20] sm:$0xff]  ;;  %v1083_v16 = vld [vmem:[#allocation4 + $0x18] sm:$0xff] }
  0x12   :  { %598 = vmatpush.bf16.msra.mxu0 %v1086_v4  ;;  %v1092_v13 = vld [vmem:[#allocation4 + $0x60] sm:$0xff]  ;;  %v1091_v17 = vld [vmem:[#allocation4 + $0x58] sm:$0xff]  ;;  %v1082_v20 = vld [vmem:[#allocation4 + $0x10] sm:$0xff] }
  0x13   :  { %611 = vmatpush.bf16.msra.mxu1 %v1094_v5  ;;  %v1100_v14 = vld [vmem:[#allocation4 + $0xa0] sm:$0xff]  ;;  %v1099_v18 = vld [vmem:[#allocation4 + $0x98] sm:$0xff]  ;;  %v1090_v21 = vld [vmem:[#allocation4 + $0x50] sm:$0xff] }
  0x14   :  { %624 = vmatpush.bf16.msra.mxu2 %v1102_v6  ;;  %v1108_v15 = vld [vmem:[#allocation4 + $0xe0] sm:$0xff]  ;;  %v1107_v19 = vld [vmem:[#allocation4 + $0xd8] sm:$0xff]  ;;  %v1098_v22 = vld [vmem:[#allocation4 + $0x90] sm:$0xff] }
  0x15   :  { %637 = vmatpush.bf16.msra.mxu3 %v1110_v7  ;;  %v1106_v23 = vld [vmem:[#allocation4 + $0xd0] sm:$0xff]  ;;  %v1081_v24 = vld [vmem:[#allocation4 + $0x8] sm:$0xff]  ;;  %v1080_v28 = vld [vmem:[#allocation4] sm:$0xff] }
  0x16   :  { %599 = vmatpush.bf16.msra.mxu0 %v1085_v8  ;;  %v1089_v25 = vld [vmem:[#allocation4 + $0x48] sm:$0xff]  ;;  %v1088_v29 = vld [vmem:[#allocation4 + $0x40] sm:$0xff]  ;;  %v1119_v32 = vld [vmem:[#allocation4 + $0x138] sm:$0xff] }
  0x17   :  { %612 = vmatpush.bf16.msra.mxu1 %v1093_v9  ;;  %v1097_v26 = vld [vmem:[#allocation4 + $0x88] sm:$0xff]  ;;  %v1096_v30 = vld [vmem:[#allocation4 + $0x80] sm:$0xff]  ;;  %v67_v33 = vld [vmem:[#allocation2 + $0x10] sm:$0xff] }
  0x18   :  { %625 = vmatpush.bf16.msra.mxu2 %v1101_v10  ;;  %v1105_v27 = vld [vmem:[#allocation4 + $0xc8] sm:$0xff]  ;;  %v1104_v31 = vld [vmem:[#allocation4 + $0xc0] sm:$0xff]  ;;  %v1127_v35 = vld [vmem:[#allocation4 + $0x178] sm:$0xff]  ;;  %v75_v40 = vpack.c.bf16 %v67_v33, %v67_v33 }
  0x19   :  { %638 = vmatpush.bf16.msra.mxu3 %v1109_v11  ;;  %v65_v34 = vld [vmem:[#allocation2] sm:$0xff]  ;;  %v68_v36 = vld [vmem:[#allocation2 + $0x18] sm:$0xff]  ;;  %v66_v37 = vld [vmem:[#allocation2 + $0x8] sm:$0xff] }
  0x1a   :  { %600 = vmatpush.bf16.msra.mxu0 %v1084_v12  ;;  %v1135_v38 = vld [vmem:[#allocation4 + $0x1b8] sm:$0xff]  ;;  %v73_v41 = vpack.c.bf16 %v65_v34, %v65_v34  ;;  %v76_v42 = vpack.c.bf16 %v68_v36, %v68_v36  ;;  %v74_v43 = vpack.c.bf16 %v66_v37, %v66_v37  ;;  %v1118_v44 = vld [vmem:[#allocation4 + $0x130] sm:$0xff]  ;;  %v1117_v48 = vld [vmem:[#allocation4 + $0x128] sm:$0xff] }
  0x1b   :  { %613 = vmatpush.bf16.msra.mxu1 %v1092_v13  ;;  %v1143_v39 = vld [vmem:[#allocation4 + $0x1f8] sm:$0xff]  ;;  %v1126_v45 = vld [vmem:[#allocation4 + $0x170] sm:$0xff]  ;;  %v1125_v49 = vld [vmem:[#allocation4 + $0x168] sm:$0xff] }
  0x1c   :  { %626 = vmatpush.bf16.msra.mxu2 %v1100_v14  ;;  %v1134_v46 = vld [vmem:[#allocation4 + $0x1b0] sm:$0xff]  ;;  %v1133_v50 = vld [vmem:[#allocation4 + $0x1a8] sm:$0xff]  ;;  %v1116_v52 = vld [vmem:[#allocation4 + $0x120] sm:$0xff] }
  0x1d   :  { %639 = vmatpush.bf16.msra.mxu3 %v1108_v15  ;;  %v1142_v47 = vld [vmem:[#allocation4 + $0x1f0] sm:$0xff]  ;;  %v1141_v51 = vld [vmem:[#allocation4 + $0x1e8] sm:$0xff]  ;;  %v1124_v53 = vld [vmem:[#allocation4 + $0x160] sm:$0xff] }
  0x1e   :  { %601 = vmatpush.bf16.msra.mxu0 %v1083_v16  ;;  %v1132_v54 = vld [vmem:[#allocation4 + $0x1a0] sm:$0xff]  ;;  %v1115_v56 = vld [vmem:[#allocation4 + $0x118] sm:$0xff]  ;;  %v1114_v60 = vld [vmem:[#allocation4 + $0x110] sm:$0xff] }
  0x1f   :  { %614 = vmatpush.bf16.msra.mxu1 %v1091_v17  ;;  %v1140_v55 = vld [vmem:[#allocation4 + $0x1e0] sm:$0xff]  ;;  %v1123_v57 = vld [vmem:[#allocation4 + $0x158] sm:$0xff]  ;;  %v1122_v61 = vld [vmem:[#allocation4 + $0x150] sm:$0xff] }
  0x20   :  { %627 = vmatpush.bf16.msra.mxu2 %v1099_v18  ;;  %v1131_v58 = vld [vmem:[#allocation4 + $0x198] sm:$0xff]  ;;  %v1130_v62 = vld [vmem:[#allocation4 + $0x190] sm:$0xff]  ;;  %v1113_v0 = vld [vmem:[#allocation4 + $0x108] sm:$0xff] }
  0x21   :  { %640 = vmatpush.bf16.msra.mxu3 %v1107_v19  ;;  %v1139_v59 = vld [vmem:[#allocation4 + $0x1d8] sm:$0xff]  ;;  %v1138_v63 = vld [vmem:[#allocation4 + $0x1d0] sm:$0xff]  ;;  %v1121_v1 = vld [vmem:[#allocation4 + $0x148] sm:$0xff] }
  0x22   :  { %602 = vmatpush.bf16.msra.mxu0 %v1082_v20  ;;  %v1129_v2 = vld [vmem:[#allocation4 + $0x188] sm:$0xff]  ;;  %v1112_v4 = vld [vmem:[#allocation4 + $0x100] sm:$0xff]  ;;  %v71_v10 = vld [vmem:[#allocation2 + $0x30] sm:$0xff] }
  0x23   :  { %615 = vmatpush.bf16.msra.mxu1 %v1090_v21  ;;  %v1137_v3 = vld [vmem:[#allocation4 + $0x1c8] sm:$0xff]  ;;  %v1120_v5 = vld [vmem:[#allocation4 + $0x140] sm:$0xff]  ;;  %v72_v11 = vld [vmem:[#allocation2 + $0x38] sm:$0xff]  ;;  %v79_v14 = vpack.c.bf16 %v71_v10, %v71_v10 }
  0x24   :  { %628 = vmatpush.bf16.msra.mxu2 %v1098_v22  ;;  %v1128_v6 = vld [vmem:[#allocation4 + $0x180] sm:$0xff]  ;;  %v70_v8 = vld [vmem:[#allocation2 + $0x28] sm:$0xff]  ;;  %v80_v15 = vpack.c.bf16 %v72_v11, %v72_v11  ;;  %v1151_v16 = vld [vmem:[#allocation6 + $0x38] sm:$0xff] }
  0x25   :  { %641 = vmatpush.bf16.msra.mxu3 %v1106_v23  ;;  %v69_v7 = vld [vmem:[#allocation2 + $0x20] sm:$0xff]  ;;  %v78_v13 = vpack.c.bf16 %v70_v8, %v70_v8  ;;  %v1150_v17 = vld [vmem:[#allocation6 + $0x30] sm:$0xff]  ;;  %v1149_v18 = vld [vmem:[#allocation6 + $0x28] sm:$0xff] }
  0x26   :  { %603 = vmatpush.bf16.msra.mxu0 %v1081_v24  ;;  %v1136_v9 = vld [vmem:[#allocation4 + $0x1c0] sm:$0xff]  ;;  %v77_v12 = vpack.c.bf16 %v69_v7, %v69_v7  ;;  %v1147_v20 = vld [vmem:[#allocation6 + $0x18] sm:$0xff]  ;;  %v1146_v22 = vld [vmem:[#allocation6 + $0x10] sm:$0xff] }
  0x27   :  { %616 = vmatpush.bf16.msra.mxu1 %v1089_v25  ;;  %v1148_v19 = vld [vmem:[#allocation6 + $0x20] sm:$0xff]  ;;  %v1145_v24 = vld [vmem:[#allocation6 + $0x8] sm:$0xff] }
  0x28   :  { %629 = vmatpush.bf16.msra.mxu2 %v1097_v26 }
  0x29   :  { %642 = vmatpush.bf16.msra.mxu3 %v1105_v27 }
  0x2a   :  { %604 = vmatpush.bf16.msra.mxu0 %v1080_v28  ;;  %v1144_v28 = vld [vmem:[#allocation6] sm:$0xff] }
  0x2b   :  { %617 = vmatpush.bf16.msra.mxu1 %v1088_v29 }
  0x2c   :  { %630 = vmatpush.bf16.msra.mxu2 %v1096_v30  ;;  %v1157_v30 = vld [vmem:[%s1290_s2] ss:$0 sm:$0xff] }
  0x2d   :  { %643 = vmatpush.bf16.msra.mxu3 %v1104_v31  ;;  %605 = vmatmul.bf16.vlgmr.msra.gmra.mxu0 %v73_v41 }
  0x2e   :  { %649 = vmatpush.bf16.msrb.mxu0 %v1119_v32  ;;  %618 = vmatmul.bf16.vlgmr.msra.gmra.mxu1 %v74_v43 }
  0x2f   :  { %662 = vmatpush.bf16.msrb.mxu1 %v1127_v35  ;;  %631 = vmatmul.bf16.vlgmr.msra.gmra.mxu2 %v75_v40 }
  0x30   :  { %675 = vmatpush.bf16.msrb.mxu2 %v1135_v38  ;;  %644 = vmatmul.bf16.vlgmr.msra.gmra.mxu3 %v76_v42 }
  0x31   :  { %688 = vmatpush.bf16.msrb.mxu3 %v1143_v39 }
  0x32   :  { %650 = vmatpush.bf16.msrb.mxu0 %v1118_v44 }
  0x33   :  { %663 = vmatpush.bf16.msrb.mxu1 %v1126_v45 }
  0x34   :  { %676 = vmatpush.bf16.msrb.mxu2 %v1134_v46 }
  0x35   :  { %689 = vmatpush.bf16.msrb.mxu3 %v1142_v47 }
  0x36   :  { %651 = vmatpush.bf16.msrb.mxu0 %v1117_v48 }
  0x37   :  { %664 = vmatpush.bf16.msrb.mxu1 %v1125_v49 }
  0x38   :  { %677 = vmatpush.bf16.msrb.mxu2 %v1133_v50 }
  0x39   :  { %690 = vmatpush.bf16.msrb.mxu3 %v1141_v51  ;;  %v1158_v51 = vld [vmem:[%s1292_s4] ss:$0 sm:$0xff] }
  0x3a   :  { %652 = vmatpush.bf16.msrb.mxu0 %v1116_v52 }
  0x3b   :  { %665 = vmatpush.bf16.msrb.mxu1 %v1124_v53 }
  0x3c   :  { %678 = vmatpush.bf16.msrb.mxu2 %v1132_v54 }
  0x3d   :  { %691 = vmatpush.bf16.msrb.mxu3 %v1140_v55 }
  0x3e   :  { %653 = vmatpush.bf16.msrb.mxu0 %v1115_v56 }
  0x3f   :  { %666 = vmatpush.bf16.msrb.mxu1 %v1123_v57 }
  0x40   :  { %679 = vmatpush.bf16.msrb.mxu2 %v1131_v58 }
  0x41   :  { %692 = vmatpush.bf16.msrb.mxu3 %v1139_v59 }
  0x42   :  { %654 = vmatpush.bf16.msrb.mxu0 %v1114_v60 }
  0x43   :  { %667 = vmatpush.bf16.msrb.mxu1 %v1122_v61 }
  0x44   :  { %680 = vmatpush.bf16.msrb.mxu2 %v1130_v62 }
  0x45   :  { %693 = vmatpush.bf16.msrb.mxu3 %v1138_v63 }
  0x46   :  { %655 = vmatpush.bf16.msrb.mxu0 %v1113_v0 }
  0x47   :  { %668 = vmatpush.bf16.msrb.mxu1 %v1121_v1 }
  0x48   :  { %681 = vmatpush.bf16.msrb.mxu2 %v1129_v2 }
  0x49   :  { %694 = vmatpush.bf16.msrb.mxu3 %v1137_v3 }
  0x4a   :  { %656 = vmatpush.bf16.msrb.mxu0 %v1112_v4 }
  0x4b   :  { %669 = vmatpush.bf16.msrb.mxu1 %v1120_v5 }
  0x4c   :  { %682 = vmatpush.bf16.msrb.mxu2 %v1128_v6 }
  0x4d   :  { %695 = vmatpush.bf16.msrb.mxu3 %v1136_v9  ;;  %657 = vmatmul.bf16.vlgmr.msrb.gmra.mxu0 %v77_v12 }
  0x4e   :  { %670 = vmatmul.bf16.vlgmr.msrb.gmra.mxu1 %v78_v13  ;;  %771 = vmatpush.bf16.msra.mxu0 %v1151_v16 }
  0x4f   :  { %683 = vmatmul.bf16.vlgmr.msrb.gmra.mxu2 %v79_v14 }
  0x50   :  { %696 = vmatmul.bf16.vlgmr.msrb.gmra.mxu3 %v80_v15 }
  0x52   :  { %772 = vmatpush.bf16.msra.mxu0 %v1150_v17 }
  0x56   :  { %773 = vmatpush.bf16.msra.mxu0 %v1149_v18 }
  0x5a   :  { %774 = vmatpush.bf16.msra.mxu0 %v1148_v19 }
  0x5e   :  { %775 = vmatpush.bf16.msra.mxu0 %v1147_v20 }
  0x62   :  { %776 = vmatpush.bf16.msra.mxu0 %v1146_v22 }
  0x66   :  { %777 = vmatpush.bf16.msra.mxu0 %v1145_v24 }
  0x6a   :  { %778 = vmatpush.bf16.msra.mxu0 %v1144_v28 }
  0xaa   :  { %v606_v21 = vpop.f32.mrf.mxu0 }
  0xab   :  { %v619_v23 = vpop.f32.mrf.mxu1  ;;  %v607_v33 = vadd.f32 %v1157_v30, %v606_v21 }
  0xad   :  { %v620_v34 = vadd.f32 %v619_v23, %v607_v33 }
  0xb2   :  { %v632_v25 = vpop.f32.mrf.mxu2  ;;  %v608_v27 = vpop.f32.mrf.mxu0 }
  0xb3   :  { %v645_v26 = vpop.f32.mrf.mxu3  ;;  %v621_v29 = vpop.f32.mrf.mxu1  ;;  %v633_v35 = vadd.f32 %v632_v25, %v620_v34 }
  0xb5   :  { %v646_v36 = vadd.f32 %v645_v26, %v633_v35 }
  0xba   :  { %v634_v31 = vpop.f32.mrf.mxu2 }
  0xbb   :  { %v647_v32 = vpop.f32.mrf.mxu3 }
  0xca   :  { %v658_v37 = vpop.f32.mrf.mxu0 }
  0xcb   :  { %v671_v38 = vpop.f32.mrf.mxu1  ;;  %v659_v39 = vadd.f32 %v658_v37, %v646_v36 }
  0xcd   :  { %v672_v40 = vadd.f32 %v671_v38, %v659_v39 }
  0xd2   :  { %v684_v41 = vpop.f32.mrf.mxu2  ;;  %v660_v44 = vpop.f32.mrf.mxu0 }
  0xd3   :  { %v697_v42 = vpop.f32.mrf.mxu3  ;;  %v685_v43 = vadd.f32 %v684_v41, %v672_v40  ;;  %v673_v45 = vpop.f32.mrf.mxu1 }
  0xd5   :  { %v698_v46 = vadd.f32 %v697_v42, %v685_v43 }
  0xd7   :  { %v701_v47 = vmax.f32 %v698_v46, 0.0 }
  0xd9   :  { %v702_v48 = vpack.c.bf16 %v701_v47, %v701_v47 }
  0xda   :  { %v686_v49 = vpop.f32.mrf.mxu2 }
  0xdb   :  { %v699_v50 = vpop.f32.mrf.mxu3  ;;  %779 = vmatmul.bf16.vlgmr.msra.gmra.mxu0 %v702_v48 }
 0x158   :  { %v780_v52 = vpop.f32.mrf.mxu0 }
 0x159   :  { %v781_v53 = vadd.f32 %v1158_v51, %v780_v52 }
 0x15b   :  { %v784_v54 = vpack.c.bf16 %v781_v53, %v781_v53 }
 0x15d   :  { %785 = vst [vmem:[%s1293_s5] sm:$0xf] %v784_v54 }
 0x160   :  { %v782_v55 = vpop.f32.mrf.mxu0 }
 0x161   :  { %790 = vsyncpa [#allocation3], 1 }
 0x162   :  { %791 = vsyncpa [#allocation5], 1 }

</bundles_post_ra>
